<compile_context>
chip_gen: v5e
topology: v5e:2x2
jax: 0.10.0
libtpu: 0.0.40
codegen_flags: <defaults>
</compile_context>

<pallas_src>
import jax
import jax.numpy as jnp
from jax.experimental import pallas as pl
from jax.experimental.pallas import tpu as pltpu

NUM_BATTLEFIELDS = 10
HIDDEN = 128
TB_MAX = 1024  # batch tile (lanes); multiple of 128, fits VMEM on v5e/v6e/v7x


def policy_kernel(xT_ref, w1T_ref, b1T_ref, w2T_ref, b2T_ref, oT_ref):
    # xT_ref: (F, TB), w1T_ref: (H, F), b1T_ref: (H, 1),
    # w2T_ref: (F, H), b2T_ref: (F, 1), oT_ref: (F, TB)
    xT = xT_ref[...]

    # fc1 + ReLU  (MXU matmul, f32 accumulate); hidden on sublanes, batch on lanes
    hT = jnp.dot(w1T_ref[...], xT, preferred_element_type=jnp.float32) + b1T_ref[...]
    hT = jnp.maximum(hT, 0.0)

    # fc2
    logitsT = (
        jnp.dot(w2T_ref[...], hT, preferred_element_type=jnp.float32) + b2T_ref[...]
    )

    # numerically stable softmax over the action dim (sublane reduce), scaled by 100
    m = jnp.max(logitsT, axis=0, keepdims=True)          # (1, TB)
    e = jnp.exp(logitsT - m)                              # (10, TB)
    denom = jnp.sum(e, axis=0, keepdims=True)             # (1, TB)
    # fold the x100 into the per-column scalar (exact reciprocal: 1e-4 rtol vs ref)
    scale = 100.0 * pl.reciprocal(denom, approx=False)    # (1, TB)
    oT_ref[...] = (e * scale).astype(oT_ref.dtype)


def _round_up(n, m):
    return ((n + m - 1) // m) * m


def policy_forward(x, w1, b1, w2, b2, tb_max=TB_MAX):
    """x: (B, F). Weights stored as (in, out); biases (1, out). Returns (B, F)."""
    B, F = x.shape
    H = w1.shape[1]

    # batch tile: multiple of 128 lanes, capped so 2x-buffered blocks fit every gen
    tb = min(tb_max, _round_up(B, 128))
    n_tiles = pl.cdiv(B, tb)
    Bp = tb * n_tiles

    # layout plumbing (wrapper-side): batch on lanes, zero-pad to tile multiple
    xT = jnp.zeros((F, Bp), x.dtype).at[:, :B].set(x.T)   # (F, Bp)
    w1T = w1.T                                            # (H, F)
    b1T = b1.reshape(H, 1)                                # (H, 1)
    w2T = w2.T                                            # (F, H)
    b2T = b2.reshape(F, 1)                                # (F, 1)

    outT = pl.pallas_call(
        policy_kernel,
        out_shape=jax.ShapeDtypeStruct((F, Bp), jnp.float32),
        grid_spec=pl.GridSpec(
            grid=(n_tiles,),
            in_specs=[
                pl.BlockSpec((F, tb), lambda i: (0, i)),   # x^T : tiled over batch
                pl.BlockSpec((H, F), lambda i: (0, 0)),    # weights/biases stay
                pl.BlockSpec((H, 1), lambda i: (0, 0)),    # VMEM-resident across
                pl.BlockSpec((F, H), lambda i: (0, 0)),    # all grid steps
                pl.BlockSpec((F, 1), lambda i: (0, 0)),
            ],
            out_specs=pl.BlockSpec((F, tb), lambda i: (0, i)),
        ),
        compiler_params=pltpu.CompilerParams(
            dimension_semantics=("parallel",),             # megacore on v7x
        ),
    )(xT, w1T, b1T, w2T, b2T)

    return outT[:, :B].T


def init_params(key, num_battlefields=NUM_BATTLEFIELDS, hidden=HIDDEN):
    # Deterministic init mimicking PyTorch nn.Linear default (uniform +/- 1/sqrt(fan_in)).
    k1, k2, k3, k4 = jax.random.split(key, 4)
    bound1 = 1.0 / jnp.sqrt(num_battlefields)
    bound2 = 1.0 / jnp.sqrt(hidden)
    # Stored as (in, out) so x @ W  (equivalent to PyTorch's x @ W.T).
    w1 = jax.random.uniform(k1, (num_battlefields, hidden), jnp.float32, -bound1, bound1)
    b1 = jax.random.uniform(k2, (1, hidden), jnp.float32, -bound1, bound1)
    w2 = jax.random.uniform(k3, (hidden, num_battlefields), jnp.float32, -bound2, bound2)
    b2 = jax.random.uniform(k4, (1, num_battlefields), jnp.float32, -bound2, bound2)
    return w1, b1, w2, b2


def reference_forward(x, w1, b1, w2, b2):
    h = jnp.maximum(x @ w1 + b1, 0.0)
    logits = h @ w2 + b2
    return jax.nn.softmax(logits, axis=-1) * 100.0


if __name__ == "__main__":
    key = jax.random.PRNGKey(0)
    kx, kx2, kp = jax.random.split(key, 3)

    w1, b1, w2, b2 = init_params(kp)

    # Small primary case (matches the PyTorch module's usage).
    batch = 8
    x = jax.random.normal(kx, (batch, NUM_BATTLEFIELDS), jnp.float32)
    out = jax.block_until_ready(policy_forward(x, w1, b1, w2, b2))
    ref = reference_forward(x, w1, b1, w2, b2)
    assert out.shape == (batch, NUM_BATTLEFIELDS)
    assert jnp.allclose(out, ref, atol=1e-4, rtol=1e-4), (
        f"max abs err {jnp.max(jnp.abs(out - ref))}"
    )
    assert jnp.allclose(jnp.sum(out, axis=-1), 100.0, atol=1e-3)

    # Secondary case: non-multiple-of-128 batch exercises the padding/tiling path.
    batch2 = 200
    x2 = jax.random.normal(kx2, (batch2, NUM_BATTLEFIELDS), jnp.float32)
    out2 = jax.block_until_ready(policy_forward(x2, w1, b1, w2, b2))
    ref2 = reference_forward(x2, w1, b1, w2, b2)
    assert out2.shape == (batch2, NUM_BATTLEFIELDS)
    assert jnp.allclose(out2, ref2, atol=1e-4, rtol=1e-4), (
        f"max abs err {jnp.max(jnp.abs(out2 - ref2))}"
    )
    assert jnp.allclose(jnp.sum(out2, axis=-1), 100.0, atol=1e-3)

    print("KERNEL_OK")
</pallas_src>

<mosaic_0001>
module attributes {stable_mosaic.version = 11 : i64} {
  func.func @policy_kernel(%arg0: i32, %arg1: memref<10x128xf32, #tpu.memory_space<vmem>>, %arg2: memref<128x10xf32, #tpu.memory_space<vmem>>, %arg3: memref<128x1xf32, #tpu.memory_space<vmem>>, %arg4: memref<10x128xf32, #tpu.memory_space<vmem>>, %arg5: memref<10x1xf32, #tpu.memory_space<vmem>>, %arg6: memref<10x128xf32, #tpu.memory_space<vmem>>) attributes {dimension_semantics = [#tpu.dimension_semantics<parallel>], iteration_bounds = array<i64: 1>, scalar_prefetch = 0 : i64, scratch_operands = 0 : i64, tpu.core_type = #tpu.core_type<tc>, window_params = [{transform_indices = @transform_0, window_bounds = array<i64: 10, 128>}, {pipeline_mode = #tpu.pipeline_mode<synchronous>, transform_indices = @transform_1, window_bounds = array<i64: 128, 10>}, {pipeline_mode = #tpu.pipeline_mode<synchronous>, transform_indices = @transform_2, window_bounds = array<i64: 128, 1>}, {pipeline_mode = #tpu.pipeline_mode<synchronous>, transform_indices = @transform_3, window_bounds = array<i64: 10, 128>}, {pipeline_mode = #tpu.pipeline_mode<synchronous>, transform_indices = @transform_4, window_bounds = array<i64: 10, 1>}, {transform_indices = @transform_5, window_bounds = array<i64: 10, 128>}]} {
    %c0 = arith.constant 0 : index
    %c0_0 = arith.constant 0 : index
    %0 = vector.load %arg1[%c0, %c0_0] : memref<10x128xf32, #tpu.memory_space<vmem>>, vector<10x128xf32>
    %c0_1 = arith.constant 0 : index
    %c0_2 = arith.constant 0 : index
    %1 = vector.load %arg2[%c0_1, %c0_2] : memref<128x10xf32, #tpu.memory_space<vmem>>, vector<128x10xf32>
    %cst = arith.constant dense<0.000000e+00> : vector<128x128xf32>
    %2 = tpu.matmul %1, %0, %cst {dimension_numbers = #tpu.dot_dimension_numbers<[1], [0], [0], [1], [0, 0, 1, 1], [], []>} : vector<128x10xf32>, vector<10x128xf32>, vector<128x128xf32> -> vector<128x128xf32>
    %c0_3 = arith.constant 0 : index
    %c0_4 = arith.constant 0 : index
    %3 = vector.load %arg3[%c0_3, %c0_4] : memref<128x1xf32, #tpu.memory_space<vmem>>, vector<128x1xf32>
    %4 = vector.broadcast %3 : vector<128x1xf32> to vector<128x128xf32>
    %5 = arith.addf %2, %4 : vector<128x128xf32>
    %cst_5 = arith.constant 0.000000e+00 : f32
    %6 = vector.broadcast %cst_5 : f32 to vector<128x128xf32>
    %7 = arith.maximumf %5, %6 : vector<128x128xf32>
    %c0_6 = arith.constant 0 : index
    %c0_7 = arith.constant 0 : index
    %8 = vector.load %arg4[%c0_6, %c0_7] : memref<10x128xf32, #tpu.memory_space<vmem>>, vector<10x128xf32>
    %cst_8 = arith.constant dense<0.000000e+00> : vector<10x128xf32>
    %9 = tpu.matmul %8, %7, %cst_8 {dimension_numbers = #tpu.dot_dimension_numbers<[1], [0], [0], [1], [0, 0, 1, 1], [], []>} : vector<10x128xf32>, vector<128x128xf32>, vector<10x128xf32> -> vector<10x128xf32>
    %c0_9 = arith.constant 0 : index
    %c0_10 = arith.constant 0 : index
    %10 = vector.load %arg5[%c0_9, %c0_10] : memref<10x1xf32, #tpu.memory_space<vmem>>, vector<10x1xf32>
    %11 = vector.broadcast %10 : vector<10x1xf32> to vector<10x128xf32>
    %12 = arith.addf %9, %11 : vector<10x128xf32>
    %cst_11 = arith.constant dense<0xFF800000> : vector<128xf32>
    %13 = vector.multi_reduction <maximumf>, %12, %cst_11 [0] : vector<10x128xf32> to vector<128xf32>
    %14 = vector.shape_cast %13 : vector<128xf32> to vector<1x128xf32>
    %15 = vector.broadcast %14 : vector<1x128xf32> to vector<10x128xf32>
    %16 = arith.subf %12, %15 : vector<10x128xf32>
    %17 = math.exp %16 : vector<10x128xf32>
    %cst_12 = arith.constant dense<0.000000e+00> : vector<128xf32>
    %18 = vector.multi_reduction <add>, %17, %cst_12 [0] : vector<10x128xf32> to vector<128xf32>
    %19 = vector.shape_cast %18 : vector<128xf32> to vector<1x128xf32>
    %20 = tpu.reciprocal %19 : vector<1x128xf32> -> vector<1x128xf32>
    %cst_13 = arith.constant 1.000000e+02 : f32
    %21 = vector.broadcast %cst_13 : f32 to vector<1x128xf32>
    %22 = arith.mulf %21, %20 : vector<1x128xf32>
    %23 = vector.broadcast %22 : vector<1x128xf32> to vector<10x128xf32>
    %24 = arith.mulf %17, %23 : vector<10x128xf32>
    %c0_14 = arith.constant 0 : index
    %c0_15 = arith.constant 0 : index
    %25 = vector.load %arg6[%c0_14, %c0_15] : memref<10x128xf32, #tpu.memory_space<vmem>>, vector<10x128xf32>
    tpu.vector_store %arg6[%c0_14, %c0_15], %24 {strides = array<i32>} : memref<10x128xf32, #tpu.memory_space<vmem>>, vector<10x128xf32>,
    return
  }
  func.func @transform_0(%arg0: i32) -> (i32, i32) {
    %c0_i32 = arith.constant 0 : i32
    %c0_i32_0 = arith.constant 0 : i32
    return %c0_i32, %arg0 : i32, i32
  }
  func.func @transform_1(%arg0: i32) -> (i32, i32) {
    %c0_i32 = arith.constant 0 : i32
    %c0_i32_0 = arith.constant 0 : i32
    %c0_i32_1 = arith.constant 0 : i32
    return %c0_i32, %c0_i32_0 : i32, i32
  }
  func.func @transform_2(%arg0: i32) -> (i32, i32) {
    %c0_i32 = arith.constant 0 : i32
    %c0_i32_0 = arith.constant 0 : i32
    %c0_i32_1 = arith.constant 0 : i32
    return %c0_i32, %c0_i32_0 : i32, i32
  }
  func.func @transform_3(%arg0: i32) -> (i32, i32) {
    %c0_i32 = arith.constant 0 : i32
    %c0_i32_0 = arith.constant 0 : i32
    %c0_i32_1 = arith.constant 0 : i32
    return %c0_i32, %c0_i32_0 : i32, i32
  }
  func.func @transform_4(%arg0: i32) -> (i32, i32) {
    %c0_i32 = arith.constant 0 : i32
    %c0_i32_0 = arith.constant 0 : i32
    %c0_i32_1 = arith.constant 0 : i32
    return %c0_i32, %c0_i32_0 : i32, i32
  }
  func.func @transform_5(%arg0: i32) -> (i32, i32) {
    %c0_i32 = arith.constant 0 : i32
    %c0_i32_0 = arith.constant 0 : i32
    return %c0_i32, %arg0 : i32, i32
  }
}

</mosaic_0001>

<bundles_post_ra>
// kernel: tpu_custom_call.1
= control target key start
LH: loop header
LB: loop body
LE: loop exit
PB: predicated region body
PF: predicated region fallthrough
CT: control target
= control target key end

     0   :  { %vm184_vm0 = vcmask 1041408   ;;  %v425_v3 = vmov 0   ;;  %vm135_vm1 = vcmask 80896   ;;  %s603_s0 = inlined_call_operand.vmem [shape: f32[10,128], index: 0, kind: input, shape index: {}]   ;;  %s604_s1 = inlined_call_operand.vmem [shape: f32[128,10], index: 1, kind: input, shape index: {}]   ;;  %s605_s2 = inlined_call_operand.vmem [shape: f32[128,1], index: 2, kind: input, shape index: {}]   ;;  %s606_s3 = inlined_call_operand.vmem [shape: f32[10,128], index: 3, kind: input, shape index: {}]   ;;  %s607_s4 = inlined_call_operand.vmem [shape: f32[10,1], index: 4, kind: input, shape index: {}]   ;;  %s608_s5 = inlined_call_operand.hbm [shape: f32[10,128], index: 5, kind: output, shape index: {}]  }
   0x1   :  { %v22_v0 = vld [vmem:[%s603_s0 + $0x8] sm:$0x3]  ;;  %v54_v1 = vld [vmem:[%s605_s2 + $0x78] sm:$0xff]  ;;  %v21_v2 = vld [vmem:[%s603_s0] sm:$0xff]  ;;  %390 = vset.pattern.permute.xlu0 %v425_v3  ;;  %391 = vset.pattern.permute.xlu1 %v425_v3 }
   0x2   :  { %365 = vmatpush.msk.msra.mxu0 %vm184_vm0, %v22_v0  ;;  %382 = vmatpush.msk.msra.mxu2 %vm184_vm0, %v22_v0  ;;  %v23_v4 = vld [vmem:[%s604_s1] sm:$0xff]  ;;  %v29_v5 = vld [vmem:[%s604_s1 + $0x30] sm:$0xff]  ;;  %v52_v7 = vld [vmem:[%s605_s2 + $0x68] sm:$0xff] }
   0x3   :  { %383 = vmatpush.msk.msra.mxu3 %vm184_vm0, %v22_v0  ;;  %132 = vperm.xlu0 %390, %v54_v1   ;;  %v35_v6 = vld [vmem:[%s604_s1 + $0x60] sm:$0xff]  ;;  %v50_v8 = vld [vmem:[%s605_s2 + $0x58] sm:$0xff]  ;;  %v53_v9 = vld [vmem:[%s605_s2 + $0x70] sm:$0xff] }
   0x4   :  { %203 = vmatpush.msra.mxu0 %v21_v2  ;;  %384 = vmatpush.msra.mxu2 %v21_v2 }
   0x5   :  { %385 = vmatpush.msra.mxu3 %v21_v2  ;;  %366 = vmatmul.msk.f32.vlgmr.msra.gmra.mxu0 %vm135_vm1, %v23_v4 }
   0x6   :  { %372 = vmatmul.msk.f32.vlgmr.msra.gmra.mxu2 %vm135_vm1, %v29_v5  ;;  %378 = vmatmul.msk.f32.vlgmr.msra.gmra.mxu3 %vm135_vm1, %v35_v6 }
   0x7   :  { %122 = vperm.xlu1 %391, %v52_v7   ;;  %392 = vset.pattern.permute.xlu2 %v425_v3 }
   0x8   :  { %112 = vperm.xlu2 %392, %v50_v8  }
   0x9   :  { %10 = vsyncpa [#allocation3], 0  ;;  %v24_v10 = vld [vmem:[%s604_s1 + $0x8] sm:$0xff]  ;;  %v30_v11 = vld [vmem:[%s604_s1 + $0x38] sm:$0xff]  ;;  %s353_s16 = sshll.u32 %s608_s5, 4  ;;  %s427_s17 = smov 128   ;;  %s354_s16 = int_to_ptr.hbm [resolvable:$true] %s353_s16 }
   0xa   :  { %v36_v12 = vld [vmem:[%s604_s1 + $0x68] sm:$0xff]  ;;  %v51_v13 = vld [vmem:[%s605_s2 + $0x60] sm:$0xff]  ;;  %v49_v14 = vld [vmem:[%s605_s2 + $0x50] sm:$0xff]  ;;  %s428_s18 = smov 8  }
   0xb   :  { %127 = vperm.xlu0 %390, %v53_v9   ;;  %v48_v15 = vld [vmem:[%s605_s2 + $0x48] sm:$0xff]  ;;  %v25_v16 = vld [vmem:[%s604_s1 + $0x10] sm:$0xff]  ;;  %v31_v17 = vld [vmem:[%s604_s1 + $0x40] sm:$0xff] }
   0xc   :  { %v37_v18 = vld [vmem:[%s604_s1 + $0x70] sm:$0xff]  ;;  %v47_v19 = vld [vmem:[%s605_s2 + $0x40] sm:$0xff]  ;;  %v46_v20 = vld [vmem:[%s605_s2 + $0x38] sm:$0xff] }
   0xd   :  { %367 = vmatmul.msk.f32.gmra.mxu0 %vm135_vm1, %v24_v10  ;;  %v45_v21 = vld [vmem:[%s605_s2 + $0x30] sm:$0xff]  ;;  %v26_v22 = vld [vmem:[%s604_s1 + $0x18] sm:$0xff]  ;;  %v32_v23 = vld [vmem:[%s604_s1 + $0x48] sm:$0xff] }
   0xe   :  { %373 = vmatmul.msk.f32.gmra.mxu2 %vm135_vm1, %v30_v11  ;;  %379 = vmatmul.msk.f32.gmra.mxu3 %vm135_vm1, %v36_v12  ;;  %v38_v24 = vld [vmem:[%s604_s1 + $0x78] sm:$0xff]  ;;  %v44_v25 = vld [vmem:[%s605_s2 + $0x28] sm:$0xff]  ;;  %v43_v26 = vld [vmem:[%s605_s2 + $0x20] sm:$0xff] }
   0xf   :  { %117 = vperm.xlu1 %391, %v51_v13   ;;  %v42_v27 = vld [vmem:[%s605_s2 + $0x18] sm:$0xff]  ;;  %v27_v28 = vld [vmem:[%s604_s1 + $0x20] sm:$0xff]  ;;  %v33_v29 = vld [vmem:[%s604_s1 + $0x50] sm:$0xff] }
  0x10   :  { %107 = vperm.xlu2 %392, %v49_v14   ;;  %v41_v30 = vld [vmem:[%s605_s2 + $0x10] sm:$0xff]  ;;  %v40_v31 = vld [vmem:[%s605_s2 + $0x8] sm:$0xff]  ;;  %v39_v32 = vld [vmem:[%s605_s2] sm:$0xff] }
  0x11   :  { %v28_v33 = vld [vmem:[%s604_s1 + $0x28] sm:$0xff]  ;;  %v34_v34 = vld [vmem:[%s604_s1 + $0x58] sm:$0xff]  ;;  %v271_v36 = vld [vmem:[%s607_s4] sm:$0xff] }
  0x12   :  { %v272_v35 = vld [vmem:[%s607_s4 + $0x8] sm:$0x3] }
  0x13   :  { %102 = vperm.xlu0 %390, %v48_v15  }
  0x15   :  { %368 = vmatmul.msk.f32.gmra.mxu0 %vm135_vm1, %v25_v16 }
  0x16   :  { %374 = vmatmul.msk.f32.gmra.mxu2 %vm135_vm1, %v31_v17  ;;  %380 = vmatmul.msk.f32.gmra.mxu3 %vm135_vm1, %v37_v18 }
  0x17   :  { %97 = vperm.xlu1 %391, %v47_v19  }
  0x18   :  { %92 = vperm.xlu2 %392, %v46_v20  }
  0x1b   :  { %87 = vperm.xlu0 %390, %v45_v21  }
  0x1d   :  { %369 = vmatmul.msk.f32.gmra.mxu0 %vm135_vm1, %v26_v22 }
  0x1e   :  { %375 = vmatmul.msk.f32.gmra.mxu2 %vm135_vm1, %v32_v23  ;;  %381 = vmatmul.msk.f32.gmra.mxu3 %vm135_vm1, %v38_v24 }
  0x1f   :  { %82 = vperm.xlu1 %391, %v44_v25  }
  0x20   :  { %77 = vperm.xlu2 %392, %v43_v26  }
  0x23   :  { %72 = vperm.xlu0 %390, %v42_v27  }
  0x25   :  { %370 = vmatmul.msk.f32.gmra.mxu0 %vm135_vm1, %v27_v28 }
  0x26   :  { %376 = vmatmul.msk.f32.gmra.mxu2 %vm135_vm1, %v33_v29 }
  0x27   :  { %67 = vperm.xlu1 %391, %v41_v30  }
  0x28   :  { %62 = vperm.xlu2 %392, %v40_v31  }
  0x2b   :  { %57 = vperm.xlu0 %390, %v39_v32  }
  0x2d   :  { %371 = vmatmul.msk.f32.gmra.mxu0 %vm135_vm1, %v28_v33 }
  0x2e   :  { %377 = vmatmul.msk.f32.gmra.mxu2 %vm135_vm1, %v34_v34 }
  0x2f   :  { %280 = vperm.xlu1 %391, %v272_v35  }
  0x30   :  { %275 = vperm.xlu2 %392, %v271_v36  }
  0x62   :  { %v113_v44 = vpop.permute.xlu2 %112 }
  0x6a   :  { %v108_v53 = vpop.permute.xlu2 %107 }
  0x72   :  { %v93_v2 = vpop.permute.xlu2 %92 }
  0x75   :  { %v133_v40 = vpop.permute.xlu0 %132 }
  0x79   :  { %v123_v45 = vpop.permute.xlu1 %122 }
  0x7a   :  { %v78_v13 = vpop.permute.xlu2 %77 }
  0x7d   :  { %v128_v48 = vpop.permute.xlu0 %127 }
  0x81   :  { %v118_v52 = vpop.permute.xlu1 %117 }
  0x82   :  { %v586_v37 = vpop.f32.mrf.mxu0  ;;  %v63_v27 = vpop.permute.xlu2 %62 }
  0x85   :  { %v103_v56 = vpop.permute.xlu0 %102 }
  0x89   :  { %v223_v38 = vpop.f32.mrf.mxu2  ;;  %v241_v39 = vpop.f32.mrf.mxu3 }
  0x8a   :  { %v588_v41 = vpop.f32.mrf.mxu0  ;;  %v242_v60 = vadd.f32 %v241_v39, %v118_v52  ;;  %v98_v1 = vpop.permute.xlu1 %97  ;;  %v270_v39 = vld [vmem:[%s606_s3 + $0x8] sm:$0x3] }
  0x8b   :  { %v209_v32 = vadd.f32 %v588_v41, %v63_v27 }
  0x8c   :  { %v265_v0 = vmax.f32 %v242_v60, 0.0 }
  0x8d   :  { %v88_v3 = vpop.permute.xlu0 %87  ;;  %v254_v35 = vmax.f32 %v209_v32, 0.0 }
  0x8e   :  { %v224_v18 = vadd.f32 %v223_v38, %v88_v3  ;;  %v269_v38 = vld [vmem:[%s606_s3] sm:$0xff]  ;;  %s426_s3 = smov [#allocation2]  }
  0x8f   :  { %s351_s13 = sshll.u32 %s426_s3, 4  ;;  %s352_s13 = int_to_ptr.vmem [resolvable:$true] %s351_s13 }
  0x90   :  { %v259_v22 = vmax.f32 %v224_v18, 0.0 }
  0x91   :  { %v226_v42 = vpop.f32.mrf.mxu2  ;;  %v244_v43 = vpop.f32.mrf.mxu3 }
  0x92   :  { %v211_v49 = vpop.f32.mrf.mxu0  ;;  %v245_v57 = vadd.f32 %v244_v43, %v123_v45  ;;  %v83_v12 = vpop.permute.xlu1 %82  ;;  %v227_v14 = vadd.f32 %v226_v42, %v93_v2 }
  0x94   :  { %v266_v62 = vmax.f32 %v245_v57, 0.0  ;;  %v260_v20 = vmax.f32 %v227_v14, 0.0 }
  0x95   :  { %v73_v16 = vpop.permute.xlu0 %72 }
  0x99   :  { %v229_v46 = vpop.f32.mrf.mxu2  ;;  %v247_v47 = vpop.f32.mrf.mxu3 }
  0x9a   :  { %v248_v54 = vadd.f32 %v247_v47, %v128_v48  ;;  %v214_v58 = vpop.f32.mrf.mxu0  ;;  %v230_v10 = vadd.f32 %v229_v46, %v98_v1  ;;  %v68_v26 = vpop.permute.xlu1 %67 }
  0x9b   :  { %v215_v24 = vadd.f32 %v214_v58, %v73_v16  ;;  %v212_v28 = vadd.f32 %v211_v49, %v68_v26 }
  0x9c   :  { %v267_v61 = vmax.f32 %v248_v54, 0.0  ;;  %v261_v19 = vmax.f32 %v230_v10, 0.0 }
  0x9d   :  { %v58_v30 = vpop.permute.xlu0 %57  ;;  %v256_v31 = vmax.f32 %v215_v24, 0.0  ;;  %v255_v33 = vmax.f32 %v212_v28, 0.0 }
  0x9e   :  { %v206_v34 = vadd.f32 %v586_v37, %v58_v30  ;;  %v276_v37 = vpop.permute.xlu2 %275 }
  0xa0   :  { %v253_v36 = vmax.f32 %v206_v34, 0.0 }
  0xa1   :  { %v232_v50 = vpop.f32.mrf.mxu2  ;;  %v250_v51 = vpop.f32.mrf.mxu3 }
  0xa2   :  { %v251_v55 = vadd.f32 %v250_v51, %v133_v40  ;;  %v217_v4 = vpop.f32.mrf.mxu0  ;;  %v233_v8 = vadd.f32 %v232_v50, %v103_v56  ;;  %v281_v41 = vpop.permute.xlu1 %280 }
  0xa3   :  { %v218_v23 = vadd.f32 %v217_v4, %v78_v13 }
  0xa4   :  { %v268_v59 = vmax.f32 %v251_v55, 0.0  ;;  %v262_v15 = vmax.f32 %v233_v8, 0.0 }
  0xa5   :  { %v257_v29 = vmax.f32 %v218_v23, 0.0 }
  0xa6   :  { %283 = vmatpush.msra.mxu1 %v268_v59 }
  0xa8   :  { %284 = vmatpush.msra.mxu1 %v267_v61 }
  0xa9   :  { %v235_v63 = vpop.f32.mrf.mxu2 }
  0xaa   :  { %285 = vmatpush.msra.mxu1 %v266_v62  ;;  %v236_v6 = vadd.f32 %v235_v63, %v108_v53  ;;  %v220_v17 = vpop.f32.mrf.mxu0 }
  0xab   :  { %v221_v21 = vadd.f32 %v220_v17, %v83_v12 }
  0xac   :  { %286 = vmatpush.msra.mxu1 %v265_v0  ;;  %v263_v11 = vmax.f32 %v236_v6, 0.0 }
  0xad   :  { %v258_v25 = vmax.f32 %v221_v21, 0.0 }
  0xb1   :  { %v238_v5 = vpop.f32.mrf.mxu2 }
  0xb2   :  { %v239_v7 = vadd.f32 %v238_v5, %v113_v44 }
  0xb4   :  { %v264_v9 = vmax.f32 %v239_v7, 0.0 }
  0xb6   :  { %287 = vmatpush.msra.mxu1 %v264_v9 }
  0xb8   :  { %288 = vmatpush.msra.mxu1 %v263_v11 }
  0xba   :  { %289 = vmatpush.msra.mxu1 %v262_v15 }
  0xbc   :  { %290 = vmatpush.msra.mxu1 %v261_v19 }
  0xbe   :  { %291 = vmatpush.msra.mxu1 %v260_v20 }
  0xc0   :  { %292 = vmatpush.msra.mxu1 %v259_v22 }
  0xc2   :  { %293 = vmatpush.msra.mxu1 %v258_v25 }
  0xc4   :  { %294 = vmatpush.msra.mxu1 %v257_v29 }
  0xc6   :  { %295 = vmatpush.msra.mxu1 %v256_v31 }
  0xc8   :  { %296 = vmatpush.msra.mxu1 %v255_v33 }
  0xca   :  { %297 = vmatpush.msra.mxu1 %v254_v35 }
  0xcc   :  { %298 = vmatpush.msra.mxu1 %v253_v36 }
  0xcd   :  { %299 = vmatmul.f32.vlgmr.msra.gmra.mxu1 %v269_v38 }
  0xd5   :  { %302 = vmatmul.f32.gmra.mxu1 %v270_v39 }
 0x14a   :  { %v300_v40 = vpop.f32.mrf.mxu1 }
 0x14b   :  { %v301_v44 = vadd.f32 %v300_v40, %v276_v37 }
 0x152   :  { %v303_v42 = vpop.f32.mrf.mxu1 }
 0x153   :  { %v304_v43 = vadd.f32 %v303_v42, %v281_v41 }
 0x155   :  { %v306_v45 = vsel %vm184_vm0, %v304_v43, -inf }
 0x156   :  { %v307_v46 = vmax.f32 %v301_v44, %v306_v45 }
 0x158   :  { %v308_v47 = vrot.slane %v307_v46, 4 }
 0x15a   :  { %v309_v48 = vmax.f32 %v307_v46, %v308_v47 }
 0x15c   :  { %v310_v49 = vrot.slane %v309_v48, 2 }
 0x15e   :  { %v311_v50 = vmax.f32 %v309_v48, %v310_v49 }
 0x160   :  { %v312_v51 = vrot.slane %v311_v50, 1 }
 0x162   :  { %v313_v52 = vmax.f32 %v311_v50, %v312_v51 }
 0x164   :  { %v314_v53 = vsub.f32 %v301_v44, %v313_v52  ;;  %v315_v54 = vsub.f32 %v304_v43, %v313_v52 }
 0x166   :  { %v316_v55 = vmul.f32 1.442695, %v314_v53  ;;  %v318_v56 = vmul.f32 1.442695, %v315_v54 }
 0x168   :  { %393 = vpow2.f32 %v316_v55 }
 0x169   :  { %395 = vpow2.f32 %v318_v56 }
 0x16e   :  { %v394_v57 = vpop.eup %393 }
 0x16f   :  { %v396_v58 = vpop.eup %395 }
 0x170   :  { %v320_v59 = vsel %vm184_vm0, %v396_v58, 0.0 }
 0x171   :  { %v321_v60 = vadd.f32 %v394_v57, %v320_v59 }
 0x173   :  { %v322_v61 = vrot.slane %v321_v60, 4 }
 0x175   :  { %v323_v62 = vadd.f32 %v322_v61, %v321_v60 }
 0x177   :  { %v324_v63 = vrot.slane %v323_v62, 2 }
 0x179   :  { %v325_v0 = vadd.f32 %v324_v63, %v323_v62 }
 0x17b   :  { %v326_v1 = vrot.slane %v325_v0, 1 }
 0x17d   :  { %v327_v2 = vadd.f32 %v326_v1, %v325_v0 }
 0x17f   :  { %397 = vrcp.f32 %v327_v2  ;;  %v339_v6 = vand.u32 2147483648, %v327_v2  ;;  %v337_v8 = vand.u32 2147483647, %v327_v2  ;;  %vm333_vm3 = vweird.f32 %v327_v2 }
 0x181   :  { %v340_v10 = vor.u32 1.1754944e-38, %v339_v6  ;;  %vm338_vm5 = vcmp.eq.f32.partialorder %v337_v8, 8.507059e+37 }
 0x185   :  { %v398_v3 = vpop.eup %397 }
 0x186   :  { %v329_v4 = vmul.f32 %v398_v3, %v327_v2  ;;  %vm334_vm2 = vweird.f32 %v398_v3 }
 0x187   :  { %vm335_vm4 = vmor %vm333_vm3, %vm334_vm2 }
 0x188   :  { %v330_v5 = vsub.f32 1.0, %v329_v4 }
 0x18a   :  { %v331_v7 = vmul.f32 %v398_v3, %v330_v5 }
 0x18c   :  { %v332_v9 = vadd.f32 %v398_v3, %v331_v7 }
 0x18e   :  { %v336_v11 = vsel %vm335_vm4, %v398_v3, %v332_v9 }
 0x18f   :  { %v341_v12 = vsel %vm338_vm5, %v340_v10, %v336_v11 }
 0x190   :  { %v342_v13 = vmul.f32 100.0, %v341_v12 }
 0x192   :  { %v344_v14 = vmul.f32 %v396_v58, %v342_v13  ;;  %v343_v15 = vmul.f32 %v394_v57, %v342_v13 }
 0x194   :  { %346 = vst [vmem:[#allocation2 + $0x8] sm:$0x3] %v344_v14 }
 0x195   :  { %345 = vst [vmem:[#allocation2] sm:$0xff] %v343_v15 }
 0x196   :  { %359 = dma.vmem_to_hbm [thread:$0]  %s352_s13, 256, %s354_s16, [#allocation3], %s427_s17, %s427_s17, %s428_s18  }
 0x197   :  { %423 = dma.done.wait [#allocation3], 256  }
 0x198   :  { %424 = vsyncadd [#allocation3], 4294967040 }
 0x199   :  { %364 = vsyncpa [#allocation3], 1 }

</bundles_post_ra>
